<compile_context>
chip_gen: v5e
topology: v5e:2x2
jax: 0.10.0
libtpu: 0.0.40
codegen_flags: <defaults>
</compile_context>

<pallas_src>
import functools

import jax
import jax.numpy as jnp
from jax.experimental import pallas as pl
from jax.experimental.pallas import tpu as pltpu


def _dropout_kernel(x_ref, u_ref, o_ref, *, p: float, scale: float):
    x = x_ref[...]
    # keep with probability (1 - p): uniform u in [0, 1), keep iff u >= p.
    keep = u_ref[...] >= jnp.float32(p)
    scaled = x * jnp.asarray(scale, dtype=x.dtype)
    o_ref[...] = jnp.where(keep, scaled, jnp.zeros_like(scaled))


def _round_up(a: int, b: int) -> int:
    return ((a + b - 1) // b) * b


def dropout_pallas(x, key, p: float = 0.5, training: bool = True, *,
                   lane_width: int = 1024, block_bytes: int = 2 * 1024 * 1024):
    """Dropout over an arbitrary-shaped feature tensor via a Pallas TPU kernel."""
    p = float(p)
    if not training or p <= 0.0:
        return x                       # identity (eval mode / p == 0)
    if p >= 1.0:
        return jnp.zeros_like(x)       # torch.nn.Dropout(p=1) drops everything

    orig_shape = x.shape
    flat = x.reshape(-1)
    total = flat.shape[0]

    # Lane-dense layout: (rows, lane_width) with lane_width a large multiple
    # of 128.  Rows-per-block sized so the f32 random stream block is
    # ~block_bytes (x / out blocks are <= that).
    W = lane_width
    m = pl.cdiv(total, W)
    target_rows = max(8, _round_up(block_bytes // (4 * W), 8))
    tile_m = max(8, min(_round_up(m, 8), target_rows))
    m_pad = _round_up(m, tile_m)

    pad = m_pad * W - total
    if pad:
        flat = jnp.pad(flat, (0, pad))
    x2d = flat.reshape(m_pad, W)
    # Uniform randoms generated outside the kernel (portable; see TODO above).
    u2d = jax.random.uniform(key, (m_pad, W), dtype=jnp.float32)

    kernel = functools.partial(_dropout_kernel, p=p, scale=1.0 / (1.0 - p))
    out2d = pl.pallas_call(
        kernel,
        out_shape=jax.ShapeDtypeStruct((m_pad, W), x.dtype),
        grid=(m_pad // tile_m,),
        in_specs=[
            pl.BlockSpec((tile_m, W), lambda i: (i, 0)),   # x block
            pl.BlockSpec((tile_m, W), lambda i: (i, 0)),   # uniform block
        ],
        out_specs=pl.BlockSpec((tile_m, W), lambda i: (i, 0)),
        compiler_params=pltpu.CompilerParams(
            dimension_semantics=("parallel",)),            # rows are independent
    )(x2d, u2d)

    out = out2d.reshape(-1)
    if pad:
        out = out[:total]
    return out.reshape(orig_shape)


if __name__ == "__main__":
    # Synthetic sparse-tensor features: N active points, C channels
    # (VGG16-BN stage4 feature width is 512).
    N, C = 256, 512
    p = 0.5

    key = jax.random.PRNGKey(0)
    k_feat, k_drop = jax.random.split(key)
    feats = jax.random.normal(k_feat, (N, C), dtype=jnp.float32)

    out = jax.block_until_ready(dropout_pallas(feats, k_drop, p=p, training=True))
    assert out.shape == feats.shape and out.dtype == feats.dtype

    # Sanity checks on dropout semantics.
    zero_frac = float(jnp.mean(out == 0.0))
    kept = out != 0.0
    max_err = float(jnp.max(jnp.abs(jnp.where(kept, out - feats / (1.0 - p), 0.0))))
    assert 0.45 < zero_frac < 0.55, f"unexpected drop fraction {zero_frac}"
    assert max_err < 1e-5, f"kept values not scaled correctly, err={max_err}"

    # Eval mode is the identity.
    out_eval = jax.block_until_ready(dropout_pallas(feats, k_drop, p=p, training=False))
    assert bool(jnp.all(out_eval == feats))

    # p >= 1 drops everything (no inf/NaN from 1/(1-p)).
    out_all = jax.block_until_ready(dropout_pallas(feats, k_drop, p=1.0, training=True))
    assert bool(jnp.all(out_all == 0.0))

    print("KERNEL_OK")
</pallas_src>

<mosaic_0001>
module attributes {stable_mosaic.version = 11 : i64} {
  func.func @_dropout_kernel(%arg0: i32, %arg1: memref<128x1024xf32, #tpu.memory_space<vmem>>, %arg2: memref<128x1024xf32, #tpu.memory_space<vmem>>, %arg3: memref<128x1024xf32, #tpu.memory_space<vmem>>) attributes {dimension_semantics = [#tpu.dimension_semantics<parallel>], iteration_bounds = array<i64: 1>, scalar_prefetch = 0 : i64, scratch_operands = 0 : i64, tpu.core_type = #tpu.core_type<tc>, window_params = [{transform_indices = @transform_0, window_bounds = array<i64: 128, 1024>}, {transform_indices = @transform_1, window_bounds = array<i64: 128, 1024>}, {transform_indices = @transform_2, window_bounds = array<i64: 128, 1024>}]} {
    %c0 = arith.constant 0 : index
    %c0_0 = arith.constant 0 : index
    %0 = vector.load %arg1[%c0, %c0_0] : memref<128x1024xf32, #tpu.memory_space<vmem>>, vector<128x1024xf32>
    %c0_1 = arith.constant 0 : index
    %c0_2 = arith.constant 0 : index
    %1 = vector.load %arg2[%c0_1, %c0_2] : memref<128x1024xf32, #tpu.memory_space<vmem>>, vector<128x1024xf32>
    %cst = arith.constant 5.000000e-01 : f32
    %2 = vector.broadcast %cst : f32 to vector<128x1024xf32>
    %3 = arith.cmpf oge, %1, %2 : vector<128x1024xf32>
    %cst_3 = arith.constant 2.000000e+00 : f32
    %4 = vector.broadcast %cst_3 : f32 to vector<128x1024xf32>
    %5 = arith.mulf %0, %4 : vector<128x1024xf32>
    %cst_4 = arith.constant 0.000000e+00 : f32
    %6 = vector.broadcast %cst_4 : f32 to vector<128x1024xf32>
    %7 = arith.select %3, %5, %6 : vector<128x1024xi1>, vector<128x1024xf32>
    %c0_5 = arith.constant 0 : index
    %c0_6 = arith.constant 0 : index
    %8 = vector.load %arg3[%c0_5, %c0_6] : memref<128x1024xf32, #tpu.memory_space<vmem>>, vector<128x1024xf32>
    tpu.vector_store %arg3[%c0_5, %c0_6], %7 {strides = array<i32>} : memref<128x1024xf32, #tpu.memory_space<vmem>>, vector<128x1024xf32>,
    return
  }
  func.func @transform_0(%arg0: i32) -> (i32, i32) {
    %c0_i32 = arith.constant 0 : i32
    %c0_i32_0 = arith.constant 0 : i32
    return %arg0, %c0_i32 : i32, i32
  }
  func.func @transform_1(%arg0: i32) -> (i32, i32) {
    %c0_i32 = arith.constant 0 : i32
    %c0_i32_0 = arith.constant 0 : i32
    return %arg0, %c0_i32 : i32, i32
  }
  func.func @transform_2(%arg0: i32) -> (i32, i32) {
    %c0_i32 = arith.constant 0 : i32
    %c0_i32_0 = arith.constant 0 : i32
    return %arg0, %c0_i32 : i32, i32
  }
}

</mosaic_0001>

<bundles_post_ra>
// kernel: tpu_custom_call.1
= control target key start
LH: loop header
LB: loop body
LE: loop exit
PB: predicated region body
PF: predicated region fallthrough
CT: control target
= control target key end

     0   :  { %7 = vsyncpa [#allocation3], 0  ;;  %s953_s0 = inlined_call_operand.hbm [shape: f32[128,1024], index: 0, kind: input, shape index: {}]   ;;  %s954_s1 = inlined_call_operand.hbm [shape: f32[128,1024], index: 1, kind: input, shape index: {}]   ;;  %s955_s2 = inlined_call_operand.hbm [shape: f32[128,1024], index: 2, kind: output, shape index: {}]  }
   0x1   :  { %8 = vsyncpa [#allocation6], 0 }
   0x2   :  { %9 = vsyncpa [#allocation4], 0  ;;  %s14_s11 = sshll.u32 %s953_s0, 4  ;;  %s915_s12 = smov [#allocation2]   ;;  %s15_s11 = int_to_ptr.hbm [resolvable:$true] %s14_s11 }
   0x3   :  { %s16_s13 = sshll.u32 %s915_s12, 4  ;;  %s27_s16 = sshll.u32 %s954_s1, 4  ;;  %s17_s13 = int_to_ptr.vmem [resolvable:$true] %s16_s13  ;;  %s28_s16 = int_to_ptr.hbm [resolvable:$true] %s27_s16 }
   0x4   :  { %s916_s17 = smov 1024   ;;  %s917_s18 = smov 64  }
   0x5   :  { %22 = dma.hbm_to_vmem [thread:$0]  %s15_s11, 16384, %s17_s13, [#allocation3], %s916_s17, %s916_s17, %s917_s18  }
   0x6   :  { %s918_s19 = smov [#allocation5]  }
   0x7   :  { %s29_s20 = sshll.u32 %s918_s19, 4  ;;  %s30_s20 = int_to_ptr.vmem [resolvable:$true] %s29_s20 }
   0x8   :  { %35 = dma.hbm_to_vmem [thread:$0]  %s28_s16, 16384, %s30_s20, [#allocation6], %s916_s17, %s916_s17, %s917_s18  }
   0x9   :  { %909 = dma.done.wait [#allocation3], 16384  }
   0xa   :  { %910 = vsyncadd [#allocation3], 4294950912 }
   0xb   :  { %911 = dma.done.wait [#allocation6], 16384  }
   0xc   :  { %912 = vsyncadd [#allocation6], 4294950912  ;;  %v44_v0 = vld [vmem:[#allocation2] sm:$0xff]  ;;  %v45_v2 = vld [vmem:[#allocation2 + $0x8] sm:$0xff]  ;;  %s818_s21 = sshll.u32 %s955_s2, 4  ;;  %s919_s22 = smov [#allocation7]   ;;  %s819_s21 = int_to_ptr.hbm [resolvable:$true] %s818_s21 }
   0xd   :  { %v172_v1 = vld [vmem:[#allocation5] sm:$0xff]  ;;  %v428_v3 = vmul.f32 2.0, %v44_v0  ;;  %v173_v4 = vld [vmem:[#allocation5 + $0x8] sm:$0xff]  ;;  %v429_v5 = vmul.f32 2.0, %v45_v2  ;;  %v46_v6 = vld [vmem:[#allocation2 + $0x10] sm:$0xff]  ;;  %s816_s23 = sshll.u32 %s919_s22, 4  ;;  %s817_s23 = int_to_ptr.vmem [resolvable:$true] %s816_s23 }
   0xe   :  { %vm300_vm0 = vcmp.ge.f32.partialorder %v172_v1, 0.5  ;;  %v174_v7 = vld [vmem:[#allocation5 + $0x10] sm:$0xff]  ;;  %vm301_vm1 = vcmp.ge.f32.partialorder %v173_v4, 0.5  ;;  %v430_v8 = vmul.f32 2.0, %v46_v6  ;;  %v47_v9 = vld [vmem:[#allocation2 + $0x18] sm:$0xff]  ;;  %v48_v11 = vld [vmem:[#allocation2 + $0x20] sm:$0xff] }
   0xf   :  { %vm302_vm2 = vcmp.ge.f32.partialorder %v174_v7, 0.5  ;;  %v175_v10 = vld [vmem:[#allocation5 + $0x18] sm:$0xff]  ;;  %v556_v12 = vsel %vm300_vm0, %v428_v3, 0.0  ;;  %v557_v13 = vsel %vm301_vm1, %v429_v5, 0.0  ;;  %v431_v14 = vmul.f32 2.0, %v47_v9  ;;  %v176_v15 = vld [vmem:[#allocation5 + $0x20] sm:$0xff] }
  0x10   :  { %vm303_vm3 = vcmp.ge.f32.partialorder %v175_v10, 0.5  ;;  %v49_v16 = vld [vmem:[#allocation2 + $0x28] sm:$0xff]  ;;  %684 = vst [vmem:[#allocation7] sm:$0xff] %v556_v12  ;;  %v558_v17 = vsel %vm302_vm2, %v430_v8, 0.0  ;;  %vm304_vm4 = vcmp.ge.f32.partialorder %v176_v15, 0.5  ;;  %v432_v18 = vmul.f32 2.0, %v48_v11 }
  0x11   :  { %v177_v19 = vld [vmem:[#allocation5 + $0x28] sm:$0xff]  ;;  %v433_v20 = vmul.f32 2.0, %v49_v16  ;;  %685 = vst [vmem:[#allocation7 + $0x8] sm:$0xff] %v557_v13  ;;  %v559_v21 = vsel %vm303_vm3, %v431_v14, 0.0  ;;  %v50_v22 = vld [vmem:[#allocation2 + $0x30] sm:$0xff]  ;;  %v51_v24 = vld [vmem:[#allocation2 + $0x38] sm:$0xff] }
  0x12   :  { %vm305_vm5 = vcmp.ge.f32.partialorder %v177_v19, 0.5  ;;  %v178_v23 = vld [vmem:[#allocation5 + $0x30] sm:$0xff]  ;;  %686 = vst [vmem:[#allocation7 + $0x10] sm:$0xff] %v558_v17  ;;  %v560_v25 = vsel %vm304_vm4, %v432_v18, 0.0  ;;  %v434_v27 = vmul.f32 2.0, %v50_v22  ;;  %v179_v28 = vld [vmem:[#allocation5 + $0x38] sm:$0xff] }
  0x13   :  { %v561_v26 = vsel %vm305_vm5, %v433_v20, 0.0  ;;  %vm306_vm6 = vcmp.ge.f32.partialorder %v178_v23, 0.5  ;;  %687 = vst [vmem:[#allocation7 + $0x18] sm:$0xff] %v559_v21  ;;  %vm307_vm7 = vcmp.ge.f32.partialorder %v179_v28, 0.5  ;;  %v435_v29 = vmul.f32 2.0, %v51_v24  ;;  %v52_v30 = vld [vmem:[#allocation2 + $0x40] sm:$0xff] }
  0x14   :  { %v180_v31 = vld [vmem:[#allocation5 + $0x40] sm:$0xff]  ;;  %v53_v32 = vld [vmem:[#allocation2 + $0x48] sm:$0xff]  ;;  %688 = vst [vmem:[#allocation7 + $0x20] sm:$0xff] %v560_v25  ;;  %v562_v33 = vsel %vm306_vm6, %v434_v27, 0.0  ;;  %v436_v34 = vmul.f32 2.0, %v52_v30  ;;  %v54_v38 = vld [vmem:[#allocation2 + $0x50] sm:$0xff] }
  0x15   :  { %vm308_vm8 = vcmp.ge.f32.partialorder %v180_v31, 0.5  ;;  %v181_v35 = vld [vmem:[#allocation5 + $0x48] sm:$0xff]  ;;  %v437_v36 = vmul.f32 2.0, %v53_v32  ;;  %689 = vst [vmem:[#allocation7 + $0x28] sm:$0xff] %v561_v26  ;;  %v563_v37 = vsel %vm307_vm7, %v435_v29, 0.0  ;;  %v182_v39 = vld [vmem:[#allocation5 + $0x50] sm:$0xff] }
  0x16   :  { %vm309_vm9 = vcmp.ge.f32.partialorder %v181_v35, 0.5  ;;  %v55_v40 = vld [vmem:[#allocation2 + $0x58] sm:$0xff]  ;;  %690 = vst [vmem:[#allocation7 + $0x30] sm:$0xff] %v562_v33  ;;  %v564_v41 = vsel %vm308_vm8, %v436_v34, 0.0  ;;  %vm310_vm10 = vcmp.ge.f32.partialorder %v182_v39, 0.5  ;;  %v438_v43 = vmul.f32 2.0, %v54_v38 }
  0x17   :  { %v565_v42 = vsel %vm309_vm9, %v437_v36, 0.0  ;;  %v183_v44 = vld [vmem:[#allocation5 + $0x58] sm:$0xff]  ;;  %691 = vst [vmem:[#allocation7 + $0x38] sm:$0xff] %v563_v37  ;;  %v439_v45 = vmul.f32 2.0, %v55_v40  ;;  %v56_v46 = vld [vmem:[#allocation2 + $0x60] sm:$0xff]  ;;  %v57_v48 = vld [vmem:[#allocation2 + $0x68] sm:$0xff] }
  0x18   :  { %vm311_vm11 = vcmp.ge.f32.partialorder %v183_v44, 0.5  ;;  %v184_v47 = vld [vmem:[#allocation5 + $0x60] sm:$0xff]  ;;  %692 = vst [vmem:[#allocation7 + $0x40] sm:$0xff] %v564_v41  ;;  %v566_v49 = vsel %vm310_vm10, %v438_v43, 0.0  ;;  %v440_v50 = vmul.f32 2.0, %v56_v46  ;;  %v185_v51 = vld [vmem:[#allocation5 + $0x68] sm:$0xff] }
  0x19   :  { %vm312_vm12 = vcmp.ge.f32.partialorder %v184_v47, 0.5  ;;  %v441_v52 = vmul.f32 2.0, %v57_v48  ;;  %693 = vst [vmem:[#allocation7 + $0x48] sm:$0xff] %v565_v42  ;;  %v567_v53 = vsel %vm311_vm11, %v439_v45, 0.0  ;;  %vm313_vm13 = vcmp.ge.f32.partialorder %v185_v51, 0.5  ;;  %v58_v54 = vld [vmem:[#allocation2 + $0x70] sm:$0xff] }
  0x1a   :  { %v186_v55 = vld [vmem:[#allocation5 + $0x70] sm:$0xff]  ;;  %v59_v56 = vld [vmem:[#allocation2 + $0x78] sm:$0xff]  ;;  %694 = vst [vmem:[#allocation7 + $0x50] sm:$0xff] %v566_v49  ;;  %v568_v57 = vsel %vm312_vm12, %v440_v50, 0.0  ;;  %v442_v59 = vmul.f32 2.0, %v58_v54  ;;  %v60_v62 = vld [vmem:[#allocation2 + $0x80] sm:$0xff] }
  0x1b   :  { %v569_v58 = vsel %vm313_vm13, %v441_v52, 0.0  ;;  %vm314_vm14 = vcmp.ge.f32.partialorder %v186_v55, 0.5  ;;  %v187_v60 = vld [vmem:[#allocation5 + $0x78] sm:$0xff]  ;;  %695 = vst [vmem:[#allocation7 + $0x58] sm:$0xff] %v567_v53  ;;  %v443_v61 = vmul.f32 2.0, %v59_v56  ;;  %v188_v63 = vld [vmem:[#allocation5 + $0x80] sm:$0xff] }
  0x1c   :  { %vm315_vm15 = vcmp.ge.f32.partialorder %v187_v60, 0.5  ;;  %v61_v0 = vld [vmem:[#allocation2 + $0x88] sm:$0xff]  ;;  %696 = vst [vmem:[#allocation7 + $0x60] sm:$0xff] %v568_v57  ;;  %v570_v1 = vsel %vm314_vm14, %v442_v59, 0.0  ;;  %vm316_vm0 = vcmp.ge.f32.partialorder %v188_v63, 0.5  ;;  %v444_v2 = vmul.f32 2.0, %v60_v62 }
  0x1d   :  { %v189_v3 = vld [vmem:[#allocation5 + $0x88] sm:$0xff]  ;;  %v445_v4 = vmul.f32 2.0, %v61_v0  ;;  %697 = vst [vmem:[#allocation7 + $0x68] sm:$0xff] %v569_v58  ;;  %v571_v5 = vsel %vm315_vm15, %v443_v61, 0.0  ;;  %v62_v6 = vld [vmem:[#allocation2 + $0x90] sm:$0xff]  ;;  %v63_v8 = vld [vmem:[#allocation2 + $0x98] sm:$0xff] }
  0x1e   :  { %vm317_vm1 = vcmp.ge.f32.partialorder %v189_v3, 0.5  ;;  %v190_v7 = vld [vmem:[#allocation5 + $0x90] sm:$0xff]  ;;  %698 = vst [vmem:[#allocation7 + $0x70] sm:$0xff] %v570_v1  ;;  %v572_v9 = vsel %vm316_vm0, %v444_v2, 0.0  ;;  %v446_v11 = vmul.f32 2.0, %v62_v6  ;;  %v191_v12 = vld [vmem:[#allocation5 + $0x98] sm:$0xff] }
  0x1f   :  { %v573_v10 = vsel %vm317_vm1, %v445_v4, 0.0  ;;  %vm318_vm2 = vcmp.ge.f32.partialorder %v190_v7, 0.5  ;;  %699 = vst [vmem:[#allocation7 + $0x78] sm:$0xff] %v571_v5  ;;  %vm319_vm3 = vcmp.ge.f32.partialorder %v191_v12, 0.5  ;;  %v447_v13 = vmul.f32 2.0, %v63_v8  ;;  %v64_v14 = vld [vmem:[#allocation2 + $0xa0] sm:$0xff] }
  0x20   :  { %v192_v15 = vld [vmem:[#allocation5 + $0xa0] sm:$0xff]  ;;  %v65_v16 = vld [vmem:[#allocation2 + $0xa8] sm:$0xff]  ;;  %700 = vst [vmem:[#allocation7 + $0x80] sm:$0xff] %v572_v9  ;;  %v574_v17 = vsel %vm318_vm2, %v446_v11, 0.0  ;;  %v448_v18 = vmul.f32 2.0, %v64_v14  ;;  %v66_v22 = vld [vmem:[#allocation2 + $0xb0] sm:$0xff] }
  0x21   :  { %vm320_vm4 = vcmp.ge.f32.partialorder %v192_v15, 0.5  ;;  %v193_v19 = vld [vmem:[#allocation5 + $0xa8] sm:$0xff]  ;;  %v449_v20 = vmul.f32 2.0, %v65_v16  ;;  %701 = vst [vmem:[#allocation7 + $0x88] sm:$0xff] %v573_v10  ;;  %v575_v21 = vsel %vm319_vm3, %v447_v13, 0.0  ;;  %v194_v23 = vld [vmem:[#allocation5 + $0xb0] sm:$0xff] }
  0x22   :  { %vm321_vm5 = vcmp.ge.f32.partialorder %v193_v19, 0.5  ;;  %v67_v24 = vld [vmem:[#allocation2 + $0xb8] sm:$0xff]  ;;  %702 = vst [vmem:[#allocation7 + $0x90] sm:$0xff] %v574_v17  ;;  %v576_v25 = vsel %vm320_vm4, %v448_v18, 0.0  ;;  %vm322_vm6 = vcmp.ge.f32.partialorder %v194_v23, 0.5  ;;  %v450_v27 = vmul.f32 2.0, %v66_v22 }
  0x23   :  { %v577_v26 = vsel %vm321_vm5, %v449_v20, 0.0  ;;  %v195_v28 = vld [vmem:[#allocation5 + $0xb8] sm:$0xff]  ;;  %703 = vst [vmem:[#allocation7 + $0x98] sm:$0xff] %v575_v21  ;;  %v451_v29 = vmul.f32 2.0, %v67_v24  ;;  %v68_v30 = vld [vmem:[#allocation2 + $0xc0] sm:$0xff]  ;;  %v69_v32 = vld [vmem:[#allocation2 + $0xc8] sm:$0xff] }
  0x24   :  { %vm323_vm7 = vcmp.ge.f32.partialorder %v195_v28, 0.5  ;;  %v196_v31 = vld [vmem:[#allocation5 + $0xc0] sm:$0xff]  ;;  %704 = vst [vmem:[#allocation7 + $0xa0] sm:$0xff] %v576_v25  ;;  %v578_v33 = vsel %vm322_vm6, %v450_v27, 0.0  ;;  %v452_v34 = vmul.f32 2.0, %v68_v30  ;;  %v197_v35 = vld [vmem:[#allocation5 + $0xc8] sm:$0xff] }
  0x25   :  { %vm324_vm8 = vcmp.ge.f32.partialorder %v196_v31, 0.5  ;;  %v453_v36 = vmul.f32 2.0, %v69_v32  ;;  %705 = vst [vmem:[#allocation7 + $0xa8] sm:$0xff] %v577_v26  ;;  %v579_v37 = vsel %vm323_vm7, %v451_v29, 0.0  ;;  %vm325_vm9 = vcmp.ge.f32.partialorder %v197_v35, 0.5  ;;  %v70_v38 = vld [vmem:[#allocation2 + $0xd0] sm:$0xff] }
  0x26   :  { %v198_v39 = vld [vmem:[#allocation5 + $0xd0] sm:$0xff]  ;;  %v71_v40 = vld [vmem:[#allocation2 + $0xd8] sm:$0xff]  ;;  %706 = vst [vmem:[#allocation7 + $0xb0] sm:$0xff] %v578_v33  ;;  %v580_v41 = vsel %vm324_vm8, %v452_v34, 0.0  ;;  %v454_v43 = vmul.f32 2.0, %v70_v38  ;;  %v72_v46 = vld [vmem:[#allocation2 + $0xe0] sm:$0xff] }
  0x27   :  { %v581_v42 = vsel %vm325_vm9, %v453_v36, 0.0  ;;  %vm326_vm10 = vcmp.ge.f32.partialorder %v198_v39, 0.5  ;;  %v199_v44 = vld [vmem:[#allocation5 + $0xd8] sm:$0xff]  ;;  %707 = vst [vmem:[#allocation7 + $0xb8] sm:$0xff] %v579_v37  ;;  %v455_v45 = vmul.f32 2.0, %v71_v40  ;;  %v200_v47 = vld [vmem:[#allocation5 + $0xe0] sm:$0xff] }
  0x28   :  { %vm327_vm11 = vcmp.ge.f32.partialorder %v199_v44, 0.5  ;;  %v73_v48 = vld [vmem:[#allocation2 + $0xe8] sm:$0xff]  ;;  %708 = vst [vmem:[#allocation7 + $0xc0] sm:$0xff] %v580_v41  ;;  %v582_v49 = vsel %vm326_vm10, %v454_v43, 0.0  ;;  %vm328_vm12 = vcmp.ge.f32.partialorder %v200_v47, 0.5  ;;  %v456_v50 = vmul.f32 2.0, %v72_v46 }
  0x29   :  { %v201_v51 = vld [vmem:[#allocation5 + $0xe8] sm:$0xff]  ;;  %v457_v52 = vmul.f32 2.0, %v73_v48  ;;  %709 = vst [vmem:[#allocation7 + $0xc8] sm:$0xff] %v581_v42  ;;  %v583_v53 = vsel %vm327_vm11, %v455_v45, 0.0  ;;  %v74_v54 = vld [vmem:[#allocation2 + $0xf0] sm:$0xff]  ;;  %v75_v56 = vld [vmem:[#allocation2 + $0xf8] sm:$0xff] }
  0x2a   :  { %vm329_vm13 = vcmp.ge.f32.partialorder %v201_v51, 0.5  ;;  %v202_v55 = vld [vmem:[#allocation5 + $0xf0] sm:$0xff]  ;;  %710 = vst [vmem:[#allocation7 + $0xd0] sm:$0xff] %v582_v49  ;;  %v584_v57 = vsel %vm328_vm12, %v456_v50, 0.0  ;;  %v458_v59 = vmul.f32 2.0, %v74_v54  ;;  %v203_v60 = vld [vmem:[#allocation5 + $0xf8] sm:$0xff] }
  0x2b   :  { %v585_v58 = vsel %vm329_vm13, %v457_v52, 0.0  ;;  %vm330_vm14 = vcmp.ge.f32.partialorder %v202_v55, 0.5  ;;  %711 = vst [vmem:[#allocation7 + $0xd8] sm:$0xff] %v583_v53  ;;  %vm331_vm15 = vcmp.ge.f32.partialorder %v203_v60, 0.5  ;;  %v459_v61 = vmul.f32 2.0, %v75_v56  ;;  %v76_v62 = vld [vmem:[#allocation2 + $0x100] sm:$0xff] }
  0x2c   :  { %v204_v63 = vld [vmem:[#allocation5 + $0x100] sm:$0xff]  ;;  %v77_v0 = vld [vmem:[#allocation2 + $0x108] sm:$0xff]  ;;  %712 = vst [vmem:[#allocation7 + $0xe0] sm:$0xff] %v584_v57  ;;  %v586_v1 = vsel %vm330_vm14, %v458_v59, 0.0  ;;  %v460_v2 = vmul.f32 2.0, %v76_v62  ;;  %v78_v6 = vld [vmem:[#allocation2 + $0x110] sm:$0xff] }
  0x2d   :  { %vm332_vm0 = vcmp.ge.f32.partialorder %v204_v63, 0.5  ;;  %v205_v3 = vld [vmem:[#allocation5 + $0x108] sm:$0xff]  ;;  %v461_v4 = vmul.f32 2.0, %v77_v0  ;;  %713 = vst [vmem:[#allocation7 + $0xe8] sm:$0xff] %v585_v58  ;;  %v587_v5 = vsel %vm331_vm15, %v459_v61, 0.0  ;;  %v206_v7 = vld [vmem:[#allocation5 + $0x110] sm:$0xff] }
  0x2e   :  { %vm333_vm1 = vcmp.ge.f32.partialorder %v205_v3, 0.5  ;;  %v79_v8 = vld [vmem:[#allocation2 + $0x118] sm:$0xff]  ;;  %714 = vst [vmem:[#allocation7 + $0xf0] sm:$0xff] %v586_v1  ;;  %v588_v9 = vsel %vm332_vm0, %v460_v2, 0.0  ;;  %vm334_vm2 = vcmp.ge.f32.partialorder %v206_v7, 0.5  ;;  %v462_v11 = vmul.f32 2.0, %v78_v6 }
  0x2f   :  { %v589_v10 = vsel %vm333_vm1, %v461_v4, 0.0  ;;  %v207_v12 = vld [vmem:[#allocation5 + $0x118] sm:$0xff]  ;;  %715 = vst [vmem:[#allocation7 + $0xf8] sm:$0xff] %v587_v5  ;;  %v463_v13 = vmul.f32 2.0, %v79_v8  ;;  %v80_v14 = vld [vmem:[#allocation2 + $0x120] sm:$0xff]  ;;  %v81_v16 = vld [vmem:[#allocation2 + $0x128] sm:$0xff] }
  0x30   :  { %vm335_vm3 = vcmp.ge.f32.partialorder %v207_v12, 0.5  ;;  %v208_v15 = vld [vmem:[#allocation5 + $0x120] sm:$0xff]  ;;  %716 = vst [vmem:[#allocation7 + $0x100] sm:$0xff] %v588_v9  ;;  %v590_v17 = vsel %vm334_vm2, %v462_v11, 0.0  ;;  %v464_v18 = vmul.f32 2.0, %v80_v14  ;;  %v209_v19 = vld [vmem:[#allocation5 + $0x128] sm:$0xff] }
  0x31   :  { %vm336_vm4 = vcmp.ge.f32.partialorder %v208_v15, 0.5  ;;  %v465_v20 = vmul.f32 2.0, %v81_v16  ;;  %717 = vst [vmem:[#allocation7 + $0x108] sm:$0xff] %v589_v10  ;;  %v591_v21 = vsel %vm335_vm3, %v463_v13, 0.0  ;;  %vm337_vm5 = vcmp.ge.f32.partialorder %v209_v19, 0.5  ;;  %v82_v22 = vld [vmem:[#allocation2 + $0x130] sm:$0xff] }
  0x32   :  { %v210_v23 = vld [vmem:[#allocation5 + $0x130] sm:$0xff]  ;;  %v83_v24 = vld [vmem:[#allocation2 + $0x138] sm:$0xff]  ;;  %718 = vst [vmem:[#allocation7 + $0x110] sm:$0xff] %v590_v17  ;;  %v592_v25 = vsel %vm336_vm4, %v464_v18, 0.0  ;;  %v466_v27 = vmul.f32 2.0, %v82_v22  ;;  %v84_v30 = vld [vmem:[#allocation2 + $0x140] sm:$0xff] }
  0x33   :  { %v593_v26 = vsel %vm337_vm5, %v465_v20, 0.0  ;;  %vm338_vm6 = vcmp.ge.f32.partialorder %v210_v23, 0.5  ;;  %v211_v28 = vld [vmem:[#allocation5 + $0x138] sm:$0xff]  ;;  %719 = vst [vmem:[#allocation7 + $0x118] sm:$0xff] %v591_v21  ;;  %v467_v29 = vmul.f32 2.0, %v83_v24  ;;  %v212_v31 = vld [vmem:[#allocation5 + $0x140] sm:$0xff] }
  0x34   :  { %vm339_vm7 = vcmp.ge.f32.partialorder %v211_v28, 0.5  ;;  %v85_v32 = vld [vmem:[#allocation2 + $0x148] sm:$0xff]  ;;  %720 = vst [vmem:[#allocation7 + $0x120] sm:$0xff] %v592_v25  ;;  %v594_v33 = vsel %vm338_vm6, %v466_v27, 0.0  ;;  %vm340_vm8 = vcmp.ge.f32.partialorder %v212_v31, 0.5  ;;  %v468_v34 = vmul.f32 2.0, %v84_v30 }
  0x35   :  { %v213_v35 = vld [vmem:[#allocation5 + $0x148] sm:$0xff]  ;;  %v469_v36 = vmul.f32 2.0, %v85_v32  ;;  %721 = vst [vmem:[#allocation7 + $0x128] sm:$0xff] %v593_v26  ;;  %v595_v37 = vsel %vm339_vm7, %v467_v29, 0.0  ;;  %v86_v38 = vld [vmem:[#allocation2 + $0x150] sm:$0xff]  ;;  %v87_v40 = vld [vmem:[#allocation2 + $0x158] sm:$0xff] }
  0x36   :  { %vm341_vm9 = vcmp.ge.f32.partialorder %v213_v35, 0.5  ;;  %v214_v39 = vld [vmem:[#allocation5 + $0x150] sm:$0xff]  ;;  %722 = vst [vmem:[#allocation7 + $0x130] sm:$0xff] %v594_v33  ;;  %v596_v41 = vsel %vm340_vm8, %v468_v34, 0.0  ;;  %v470_v43 = vmul.f32 2.0, %v86_v38  ;;  %v215_v44 = vld [vmem:[#allocation5 + $0x158] sm:$0xff] }
  0x37   :  { %v597_v42 = vsel %vm341_vm9, %v469_v36, 0.0  ;;  %vm342_vm10 = vcmp.ge.f32.partialorder %v214_v39, 0.5  ;;  %723 = vst [vmem:[#allocation7 + $0x138] sm:$0xff] %v595_v37  ;;  %vm343_vm11 = vcmp.ge.f32.partialorder %v215_v44, 0.5  ;;  %v471_v45 = vmul.f32 2.0, %v87_v40  ;;  %v88_v46 = vld [vmem:[#allocation2 + $0x160] sm:$0xff] }
  0x38   :  { %v216_v47 = vld [vmem:[#allocation5 + $0x160] sm:$0xff]  ;;  %v89_v48 = vld [vmem:[#allocation2 + $0x168] sm:$0xff]  ;;  %724 = vst [vmem:[#allocation7 + $0x140] sm:$0xff] %v596_v41  ;;  %v598_v49 = vsel %vm342_vm10, %v470_v43, 0.0  ;;  %v472_v50 = vmul.f32 2.0, %v88_v46  ;;  %v90_v54 = vld [vmem:[#allocation2 + $0x170] sm:$0xff] }
  0x39   :  { %vm344_vm12 = vcmp.ge.f32.partialorder %v216_v47, 0.5  ;;  %v217_v51 = vld [vmem:[#allocation5 + $0x168] sm:$0xff]  ;;  %v473_v52 = vmul.f32 2.0, %v89_v48  ;;  %725 = vst [vmem:[#allocation7 + $0x148] sm:$0xff] %v597_v42  ;;  %v599_v53 = vsel %vm343_vm11, %v471_v45, 0.0  ;;  %v218_v55 = vld [vmem:[#allocation5 + $0x170] sm:$0xff] }
  0x3a   :  { %vm345_vm13 = vcmp.ge.f32.partialorder %v217_v51, 0.5  ;;  %v91_v56 = vld [vmem:[#allocation2 + $0x178] sm:$0xff]  ;;  %726 = vst [vmem:[#allocation7 + $0x150] sm:$0xff] %v598_v49  ;;  %v600_v57 = vsel %vm344_vm12, %v472_v50, 0.0  ;;  %vm346_vm14 = vcmp.ge.f32.partialorder %v218_v55, 0.5  ;;  %v474_v59 = vmul.f32 2.0, %v90_v54 }
  0x3b   :  { %v601_v58 = vsel %vm345_vm13, %v473_v52, 0.0  ;;  %v219_v60 = vld [vmem:[#allocation5 + $0x178] sm:$0xff]  ;;  %727 = vst [vmem:[#allocation7 + $0x158] sm:$0xff] %v599_v53  ;;  %v475_v61 = vmul.f32 2.0, %v91_v56  ;;  %v92_v62 = vld [vmem:[#allocation2 + $0x180] sm:$0xff]  ;;  %v93_v0 = vld [vmem:[#allocation2 + $0x188] sm:$0xff] }
  0x3c   :  { %vm347_vm15 = vcmp.ge.f32.partialorder %v219_v60, 0.5  ;;  %v220_v63 = vld [vmem:[#allocation5 + $0x180] sm:$0xff]  ;;  %728 = vst [vmem:[#allocation7 + $0x160] sm:$0xff] %v600_v57  ;;  %v602_v1 = vsel %vm346_vm14, %v474_v59, 0.0  ;;  %v476_v2 = vmul.f32 2.0, %v92_v62  ;;  %v221_v3 = vld [vmem:[#allocation5 + $0x188] sm:$0xff] }
  0x3d   :  { %vm348_vm0 = vcmp.ge.f32.partialorder %v220_v63, 0.5  ;;  %v477_v4 = vmul.f32 2.0, %v93_v0  ;;  %729 = vst [vmem:[#allocation7 + $0x168] sm:$0xff] %v601_v58  ;;  %v603_v5 = vsel %vm347_vm15, %v475_v61, 0.0  ;;  %vm349_vm1 = vcmp.ge.f32.partialorder %v221_v3, 0.5  ;;  %v94_v6 = vld [vmem:[#allocation2 + $0x190] sm:$0xff] }
  0x3e   :  { %v222_v7 = vld [vmem:[#allocation5 + $0x190] sm:$0xff]  ;;  %v95_v8 = vld [vmem:[#allocation2 + $0x198] sm:$0xff]  ;;  %730 = vst [vmem:[#allocation7 + $0x170] sm:$0xff] %v602_v1  ;;  %v604_v9 = vsel %vm348_vm0, %v476_v2, 0.0  ;;  %v478_v11 = vmul.f32 2.0, %v94_v6  ;;  %v96_v14 = vld [vmem:[#allocation2 + $0x1a0] sm:$0xff] }
  0x3f   :  { %v605_v10 = vsel %vm349_vm1, %v477_v4, 0.0  ;;  %vm350_vm2 = vcmp.ge.f32.partialorder %v222_v7, 0.5  ;;  %v223_v12 = vld [vmem:[#allocation5 + $0x198] sm:$0xff]  ;;  %731 = vst [vmem:[#allocation7 + $0x178] sm:$0xff] %v603_v5  ;;  %v479_v13 = vmul.f32 2.0, %v95_v8  ;;  %v224_v15 = vld [vmem:[#allocation5 + $0x1a0] sm:$0xff] }
  0x40   :  { %vm351_vm3 = vcmp.ge.f32.partialorder %v223_v12, 0.5  ;;  %v97_v16 = vld [vmem:[#allocation2 + $0x1a8] sm:$0xff]  ;;  %732 = vst [vmem:[#allocation7 + $0x180] sm:$0xff] %v604_v9  ;;  %v606_v17 = vsel %vm350_vm2, %v478_v11, 0.0  ;;  %vm352_vm4 = vcmp.ge.f32.partialorder %v224_v15, 0.5  ;;  %v480_v18 = vmul.f32 2.0, %v96_v14 }
  0x41   :  { %v225_v19 = vld [vmem:[#allocation5 + $0x1a8] sm:$0xff]  ;;  %v481_v20 = vmul.f32 2.0, %v97_v16  ;;  %733 = vst [vmem:[#allocation7 + $0x188] sm:$0xff] %v605_v10  ;;  %v607_v21 = vsel %vm351_vm3, %v479_v13, 0.0  ;;  %v98_v22 = vld [vmem:[#allocation2 + $0x1b0] sm:$0xff]  ;;  %v99_v24 = vld [vmem:[#allocation2 + $0x1b8] sm:$0xff] }
  0x42   :  { %vm353_vm5 = vcmp.ge.f32.partialorder %v225_v19, 0.5  ;;  %v226_v23 = vld [vmem:[#allocation5 + $0x1b0] sm:$0xff]  ;;  %734 = vst [vmem:[#allocation7 + $0x190] sm:$0xff] %v606_v17  ;;  %v608_v25 = vsel %vm352_vm4, %v480_v18, 0.0  ;;  %v482_v27 = vmul.f32 2.0, %v98_v22  ;;  %v227_v28 = vld [vmem:[#allocation5 + $0x1b8] sm:$0xff] }
  0x43   :  { %v609_v26 = vsel %vm353_vm5, %v481_v20, 0.0  ;;  %vm354_vm6 = vcmp.ge.f32.partialorder %v226_v23, 0.5  ;;  %735 = vst [vmem:[#allocation7 + $0x198] sm:$0xff] %v607_v21  ;;  %vm355_vm7 = vcmp.ge.f32.partialorder %v227_v28, 0.5  ;;  %v483_v29 = vmul.f32 2.0, %v99_v24  ;;  %v100_v30 = vld [vmem:[#allocation2 + $0x1c0] sm:$0xff] }
  0x44   :  { %v228_v31 = vld [vmem:[#allocation5 + $0x1c0] sm:$0xff]  ;;  %v101_v32 = vld [vmem:[#allocation2 + $0x1c8] sm:$0xff]  ;;  %736 = vst [vmem:[#allocation7 + $0x1a0] sm:$0xff] %v608_v25  ;;  %v610_v33 = vsel %vm354_vm6, %v482_v27, 0.0  ;;  %v484_v34 = vmul.f32 2.0, %v100_v30  ;;  %v102_v38 = vld [vmem:[#allocation2 + $0x1d0] sm:$0xff] }
  0x45   :  { %vm356_vm8 = vcmp.ge.f32.partialorder %v228_v31, 0.5  ;;  %v229_v35 = vld [vmem:[#allocation5 + $0x1c8] sm:$0xff]  ;;  %v485_v36 = vmul.f32 2.0, %v101_v32  ;;  %737 = vst [vmem:[#allocation7 + $0x1a8] sm:$0xff] %v609_v26  ;;  %v611_v37 = vsel %vm355_vm7, %v483_v29, 0.0  ;;  %v230_v39 = vld [vmem:[#allocation5 + $0x1d0] sm:$0xff] }
  0x46   :  { %vm357_vm9 = vcmp.ge.f32.partialorder %v229_v35, 0.5  ;;  %v103_v40 = vld [vmem:[#allocation2 + $0x1d8] sm:$0xff]  ;;  %738 = vst [vmem:[#allocation7 + $0x1b0] sm:$0xff] %v610_v33  ;;  %v612_v41 = vsel %vm356_vm8, %v484_v34, 0.0  ;;  %vm358_vm10 = vcmp.ge.f32.partialorder %v230_v39, 0.5  ;;  %v486_v43 = vmul.f32 2.0, %v102_v38 }
  0x47   :  { %v613_v42 = vsel %vm357_vm9, %v485_v36, 0.0  ;;  %v231_v44 = vld [vmem:[#allocation5 + $0x1d8] sm:$0xff]  ;;  %739 = vst [vmem:[#allocation7 + $0x1b8] sm:$0xff] %v611_v37  ;;  %v487_v45 = vmul.f32 2.0, %v103_v40  ;;  %v104_v46 = vld [vmem:[#allocation2 + $0x1e0] sm:$0xff]  ;;  %v105_v48 = vld [vmem:[#allocation2 + $0x1e8] sm:$0xff] }
  0x48   :  { %vm359_vm11 = vcmp.ge.f32.partialorder %v231_v44, 0.5  ;;  %v232_v47 = vld [vmem:[#allocation5 + $0x1e0] sm:$0xff]  ;;  %740 = vst [vmem:[#allocation7 + $0x1c0] sm:$0xff] %v612_v41  ;;  %v614_v49 = vsel %vm358_vm10, %v486_v43, 0.0  ;;  %v488_v50 = vmul.f32 2.0, %v104_v46  ;;  %v233_v51 = vld [vmem:[#allocation5 + $0x1e8] sm:$0xff] }
  0x49   :  { %vm360_vm12 = vcmp.ge.f32.partialorder %v232_v47, 0.5  ;;  %v489_v52 = vmul.f32 2.0, %v105_v48  ;;  %741 = vst [vmem:[#allocation7 + $0x1c8] sm:$0xff] %v613_v42  ;;  %v615_v53 = vsel %vm359_vm11, %v487_v45, 0.0  ;;  %vm361_vm13 = vcmp.ge.f32.partialorder %v233_v51, 0.5  ;;  %v106_v54 = vld [vmem:[#allocation2 + $0x1f0] sm:$0xff] }
  0x4a   :  { %v234_v55 = vld [vmem:[#allocation5 + $0x1f0] sm:$0xff]  ;;  %v107_v56 = vld [vmem:[#allocation2 + $0x1f8] sm:$0xff]  ;;  %742 = vst [vmem:[#allocation7 + $0x1d0] sm:$0xff] %v614_v49  ;;  %v616_v57 = vsel %vm360_vm12, %v488_v50, 0.0  ;;  %v490_v59 = vmul.f32 2.0, %v106_v54  ;;  %v108_v62 = vld [vmem:[#allocation2 + $0x200] sm:$0xff] }
  0x4b   :  { %v617_v58 = vsel %vm361_vm13, %v489_v52, 0.0  ;;  %vm362_vm14 = vcmp.ge.f32.partialorder %v234_v55, 0.5  ;;  %v235_v60 = vld [vmem:[#allocation5 + $0x1f8] sm:$0xff]  ;;  %743 = vst [vmem:[#allocation7 + $0x1d8] sm:$0xff] %v615_v53  ;;  %v491_v61 = vmul.f32 2.0, %v107_v56  ;;  %v236_v63 = vld [vmem:[#allocation5 + $0x200] sm:$0xff] }
  0x4c   :  { %vm363_vm15 = vcmp.ge.f32.partialorder %v235_v60, 0.5  ;;  %v109_v0 = vld [vmem:[#allocation2 + $0x208] sm:$0xff]  ;;  %744 = vst [vmem:[#allocation7 + $0x1e0] sm:$0xff] %v616_v57  ;;  %v618_v1 = vsel %vm362_vm14, %v490_v59, 0.0  ;;  %vm364_vm0 = vcmp.ge.f32.partialorder %v236_v63, 0.5  ;;  %v492_v2 = vmul.f32 2.0, %v108_v62 }
  0x4d   :  { %v237_v3 = vld [vmem:[#allocation5 + $0x208] sm:$0xff]  ;;  %v493_v4 = vmul.f32 2.0, %v109_v0  ;;  %745 = vst [vmem:[#allocation7 + $0x1e8] sm:$0xff] %v617_v58  ;;  %v619_v5 = vsel %vm363_vm15, %v491_v61, 0.0  ;;  %v110_v6 = vld [vmem:[#allocation2 + $0x210] sm:$0xff]  ;;  %v111_v8 = vld [vmem:[#allocation2 + $0x218] sm:$0xff] }
  0x4e   :  { %vm365_vm1 = vcmp.ge.f32.partialorder %v237_v3, 0.5  ;;  %v238_v7 = vld [vmem:[#allocation5 + $0x210] sm:$0xff]  ;;  %746 = vst [vmem:[#allocation7 + $0x1f0] sm:$0xff] %v618_v1  ;;  %v620_v9 = vsel %vm364_vm0, %v492_v2, 0.0  ;;  %v494_v11 = vmul.f32 2.0, %v110_v6  ;;  %v239_v12 = vld [vmem:[#allocation5 + $0x218] sm:$0xff] }
  0x4f   :  { %v621_v10 = vsel %vm365_vm1, %v493_v4, 0.0  ;;  %vm366_vm2 = vcmp.ge.f32.partialorder %v238_v7, 0.5  ;;  %747 = vst [vmem:[#allocation7 + $0x1f8] sm:$0xff] %v619_v5  ;;  %vm367_vm3 = vcmp.ge.f32.partialorder %v239_v12, 0.5  ;;  %v495_v13 = vmul.f32 2.0, %v111_v8  ;;  %v112_v14 = vld [vmem:[#allocation2 + $0x220] sm:$0xff] }
  0x50   :  { %v240_v15 = vld [vmem:[#allocation5 + $0x220] sm:$0xff]  ;;  %v113_v16 = vld [vmem:[#allocation2 + $0x228] sm:$0xff]  ;;  %748 = vst [vmem:[#allocation7 + $0x200] sm:$0xff] %v620_v9  ;;  %v622_v17 = vsel %vm366_vm2, %v494_v11, 0.0  ;;  %v496_v18 = vmul.f32 2.0, %v112_v14  ;;  %v114_v22 = vld [vmem:[#allocation2 + $0x230] sm:$0xff] }
  0x51   :  { %vm368_vm4 = vcmp.ge.f32.partialorder %v240_v15, 0.5  ;;  %v241_v19 = vld [vmem:[#allocation5 + $0x228] sm:$0xff]  ;;  %v497_v20 = vmul.f32 2.0, %v113_v16  ;;  %749 = vst [vmem:[#allocation7 + $0x208] sm:$0xff] %v621_v10  ;;  %v623_v21 = vsel %vm367_vm3, %v495_v13, 0.0  ;;  %v242_v23 = vld [vmem:[#allocation5 + $0x230] sm:$0xff] }
  0x52   :  { %vm369_vm5 = vcmp.ge.f32.partialorder %v241_v19, 0.5  ;;  %v115_v24 = vld [vmem:[#allocation2 + $0x238] sm:$0xff]  ;;  %750 = vst [vmem:[#allocation7 + $0x210] sm:$0xff] %v622_v17  ;;  %v624_v25 = vsel %vm368_vm4, %v496_v18, 0.0  ;;  %vm370_vm6 = vcmp.ge.f32.partialorder %v242_v23, 0.5  ;;  %v498_v27 = vmul.f32 2.0, %v114_v22 }
  0x53   :  { %v625_v26 = vsel %vm369_vm5, %v497_v20, 0.0  ;;  %v243_v28 = vld [vmem:[#allocation5 + $0x238] sm:$0xff]  ;;  %751 = vst [vmem:[#allocation7 + $0x218] sm:$0xff] %v623_v21  ;;  %v499_v29 = vmul.f32 2.0, %v115_v24  ;;  %v116_v30 = vld [vmem:[#allocation2 + $0x240] sm:$0xff]  ;;  %v117_v32 = vld [vmem:[#allocation2 + $0x248] sm:$0xff] }
  0x54   :  { %vm371_vm7 = vcmp.ge.f32.partialorder %v243_v28, 0.5  ;;  %v244_v31 = vld [vmem:[#allocation5 + $0x240] sm:$0xff]  ;;  %752 = vst [vmem:[#allocation7 + $0x220] sm:$0xff] %v624_v25  ;;  %v626_v33 = vsel %vm370_vm6, %v498_v27, 0.0  ;;  %v500_v34 = vmul.f32 2.0, %v116_v30  ;;  %v245_v35 = vld [vmem:[#allocation5 + $0x248] sm:$0xff] }
  0x55   :  { %vm372_vm8 = vcmp.ge.f32.partialorder %v244_v31, 0.5  ;;  %v501_v36 = vmul.f32 2.0, %v117_v32  ;;  %753 = vst [vmem:[#allocation7 + $0x228] sm:$0xff] %v625_v26  ;;  %v627_v37 = vsel %vm371_vm7, %v499_v29, 0.0  ;;  %vm373_vm9 = vcmp.ge.f32.partialorder %v245_v35, 0.5  ;;  %v118_v38 = vld [vmem:[#allocation2 + $0x250] sm:$0xff] }
  0x56   :  { %v246_v39 = vld [vmem:[#allocation5 + $0x250] sm:$0xff]  ;;  %v119_v40 = vld [vmem:[#allocation2 + $0x258] sm:$0xff]  ;;  %754 = vst [vmem:[#allocation7 + $0x230] sm:$0xff] %v626_v33  ;;  %v628_v41 = vsel %vm372_vm8, %v500_v34, 0.0  ;;  %v502_v43 = vmul.f32 2.0, %v118_v38  ;;  %v120_v46 = vld [vmem:[#allocation2 + $0x260] sm:$0xff] }
  0x57   :  { %v629_v42 = vsel %vm373_vm9, %v501_v36, 0.0  ;;  %vm374_vm10 = vcmp.ge.f32.partialorder %v246_v39, 0.5  ;;  %v247_v44 = vld [vmem:[#allocation5 + $0x258] sm:$0xff]  ;;  %755 = vst [vmem:[#allocation7 + $0x238] sm:$0xff] %v627_v37  ;;  %v503_v45 = vmul.f32 2.0, %v119_v40  ;;  %v248_v47 = vld [vmem:[#allocation5 + $0x260] sm:$0xff] }
  0x58   :  { %vm375_vm11 = vcmp.ge.f32.partialorder %v247_v44, 0.5  ;;  %v121_v48 = vld [vmem:[#allocation2 + $0x268] sm:$0xff]  ;;  %756 = vst [vmem:[#allocation7 + $0x240] sm:$0xff] %v628_v41  ;;  %v630_v49 = vsel %vm374_vm10, %v502_v43, 0.0  ;;  %vm376_vm12 = vcmp.ge.f32.partialorder %v248_v47, 0.5  ;;  %v504_v50 = vmul.f32 2.0, %v120_v46 }
  0x59   :  { %v249_v51 = vld [vmem:[#allocation5 + $0x268] sm:$0xff]  ;;  %v505_v52 = vmul.f32 2.0, %v121_v48  ;;  %757 = vst [vmem:[#allocation7 + $0x248] sm:$0xff] %v629_v42  ;;  %v631_v53 = vsel %vm375_vm11, %v503_v45, 0.0  ;;  %v122_v54 = vld [vmem:[#allocation2 + $0x270] sm:$0xff]  ;;  %v123_v56 = vld [vmem:[#allocation2 + $0x278] sm:$0xff] }
  0x5a   :  { %vm377_vm13 = vcmp.ge.f32.partialorder %v249_v51, 0.5  ;;  %v250_v55 = vld [vmem:[#allocation5 + $0x270] sm:$0xff]  ;;  %758 = vst [vmem:[#allocation7 + $0x250] sm:$0xff] %v630_v49  ;;  %v632_v57 = vsel %vm376_vm12, %v504_v50, 0.0  ;;  %v506_v59 = vmul.f32 2.0, %v122_v54  ;;  %v251_v60 = vld [vmem:[#allocation5 + $0x278] sm:$0xff] }
  0x5b   :  { %v633_v58 = vsel %vm377_vm13, %v505_v52, 0.0  ;;  %vm378_vm14 = vcmp.ge.f32.partialorder %v250_v55, 0.5  ;;  %759 = vst [vmem:[#allocation7 + $0x258] sm:$0xff] %v631_v53  ;;  %vm379_vm15 = vcmp.ge.f32.partialorder %v251_v60, 0.5  ;;  %v507_v61 = vmul.f32 2.0, %v123_v56  ;;  %v124_v62 = vld [vmem:[#allocation2 + $0x280] sm:$0xff] }
  0x5c   :  { %v252_v63 = vld [vmem:[#allocation5 + $0x280] sm:$0xff]  ;;  %v125_v0 = vld [vmem:[#allocation2 + $0x288] sm:$0xff]  ;;  %760 = vst [vmem:[#allocation7 + $0x260] sm:$0xff] %v632_v57  ;;  %v634_v1 = vsel %vm378_vm14, %v506_v59, 0.0  ;;  %v508_v2 = vmul.f32 2.0, %v124_v62  ;;  %v126_v6 = vld [vmem:[#allocation2 + $0x290] sm:$0xff] }
  0x5d   :  { %vm380_vm0 = vcmp.ge.f32.partialorder %v252_v63, 0.5  ;;  %v253_v3 = vld [vmem:[#allocation5 + $0x288] sm:$0xff]  ;;  %v509_v4 = vmul.f32 2.0, %v125_v0  ;;  %761 = vst [vmem:[#allocation7 + $0x268] sm:$0xff] %v633_v58  ;;  %v635_v5 = vsel %vm379_vm15, %v507_v61, 0.0  ;;  %v254_v7 = vld [vmem:[#allocation5 + $0x290] sm:$0xff] }
  0x5e   :  { %vm381_vm1 = vcmp.ge.f32.partialorder %v253_v3, 0.5  ;;  %v127_v8 = vld [vmem:[#allocation2 + $0x298] sm:$0xff]  ;;  %762 = vst [vmem:[#allocation7 + $0x270] sm:$0xff] %v634_v1  ;;  %v636_v9 = vsel %vm380_vm0, %v508_v2, 0.0  ;;  %vm382_vm2 = vcmp.ge.f32.partialorder %v254_v7, 0.5  ;;  %v510_v11 = vmul.f32 2.0, %v126_v6 }
  0x5f   :  { %v637_v10 = vsel %vm381_vm1, %v509_v4, 0.0  ;;  %v255_v12 = vld [vmem:[#allocation5 + $0x298] sm:$0xff]  ;;  %763 = vst [vmem:[#allocation7 + $0x278] sm:$0xff] %v635_v5  ;;  %v511_v13 = vmul.f32 2.0, %v127_v8  ;;  %v128_v14 = vld [vmem:[#allocation2 + $0x2a0] sm:$0xff]  ;;  %v129_v16 = vld [vmem:[#allocation2 + $0x2a8] sm:$0xff] }
  0x60   :  { %vm383_vm3 = vcmp.ge.f32.partialorder %v255_v12, 0.5  ;;  %v256_v15 = vld [vmem:[#allocation5 + $0x2a0] sm:$0xff]  ;;  %764 = vst [vmem:[#allocation7 + $0x280] sm:$0xff] %v636_v9  ;;  %v638_v17 = vsel %vm382_vm2, %v510_v11, 0.0  ;;  %v512_v18 = vmul.f32 2.0, %v128_v14  ;;  %v257_v19 = vld [vmem:[#allocation5 + $0x2a8] sm:$0xff] }
  0x61   :  { %vm384_vm4 = vcmp.ge.f32.partialorder %v256_v15, 0.5  ;;  %v513_v20 = vmul.f32 2.0, %v129_v16  ;;  %765 = vst [vmem:[#allocation7 + $0x288] sm:$0xff] %v637_v10  ;;  %v639_v21 = vsel %vm383_vm3, %v511_v13, 0.0  ;;  %vm385_vm5 = vcmp.ge.f32.partialorder %v257_v19, 0.5  ;;  %v130_v22 = vld [vmem:[#allocation2 + $0x2b0] sm:$0xff] }
  0x62   :  { %v258_v23 = vld [vmem:[#allocation5 + $0x2b0] sm:$0xff]  ;;  %v131_v24 = vld [vmem:[#allocation2 + $0x2b8] sm:$0xff]  ;;  %766 = vst [vmem:[#allocation7 + $0x290] sm:$0xff] %v638_v17  ;;  %v640_v25 = vsel %vm384_vm4, %v512_v18, 0.0  ;;  %v514_v27 = vmul.f32 2.0, %v130_v22  ;;  %v132_v30 = vld [vmem:[#allocation2 + $0x2c0] sm:$0xff] }
  0x63   :  { %v641_v26 = vsel %vm385_vm5, %v513_v20, 0.0  ;;  %vm386_vm6 = vcmp.ge.f32.partialorder %v258_v23, 0.5  ;;  %v259_v28 = vld [vmem:[#allocation5 + $0x2b8] sm:$0xff]  ;;  %767 = vst [vmem:[#allocation7 + $0x298] sm:$0xff] %v639_v21  ;;  %v515_v29 = vmul.f32 2.0, %v131_v24  ;;  %v260_v31 = vld [vmem:[#allocation5 + $0x2c0] sm:$0xff] }
  0x64   :  { %vm387_vm7 = vcmp.ge.f32.partialorder %v259_v28, 0.5  ;;  %v133_v32 = vld [vmem:[#allocation2 + $0x2c8] sm:$0xff]  ;;  %768 = vst [vmem:[#allocation7 + $0x2a0] sm:$0xff] %v640_v25  ;;  %v642_v33 = vsel %vm386_vm6, %v514_v27, 0.0  ;;  %vm388_vm8 = vcmp.ge.f32.partialorder %v260_v31, 0.5  ;;  %v516_v34 = vmul.f32 2.0, %v132_v30 }
  0x65   :  { %v261_v35 = vld [vmem:[#allocation5 + $0x2c8] sm:$0xff]  ;;  %v517_v36 = vmul.f32 2.0, %v133_v32  ;;  %769 = vst [vmem:[#allocation7 + $0x2a8] sm:$0xff] %v641_v26  ;;  %v643_v37 = vsel %vm387_vm7, %v515_v29, 0.0  ;;  %v134_v38 = vld [vmem:[#allocation2 + $0x2d0] sm:$0xff]  ;;  %v135_v40 = vld [vmem:[#allocation2 + $0x2d8] sm:$0xff] }
  0x66   :  { %vm389_vm9 = vcmp.ge.f32.partialorder %v261_v35, 0.5  ;;  %v262_v39 = vld [vmem:[#allocation5 + $0x2d0] sm:$0xff]  ;;  %770 = vst [vmem:[#allocation7 + $0x2b0] sm:$0xff] %v642_v33  ;;  %v644_v41 = vsel %vm388_vm8, %v516_v34, 0.0  ;;  %v518_v43 = vmul.f32 2.0, %v134_v38  ;;  %v263_v44 = vld [vmem:[#allocation5 + $0x2d8] sm:$0xff] }
  0x67   :  { %v645_v42 = vsel %vm389_vm9, %v517_v36, 0.0  ;;  %vm390_vm10 = vcmp.ge.f32.partialorder %v262_v39, 0.5  ;;  %771 = vst [vmem:[#allocation7 + $0x2b8] sm:$0xff] %v643_v37  ;;  %vm391_vm11 = vcmp.ge.f32.partialorder %v263_v44, 0.5  ;;  %v519_v45 = vmul.f32 2.0, %v135_v40  ;;  %v136_v46 = vld [vmem:[#allocation2 + $0x2e0] sm:$0xff] }
  0x68   :  { %v264_v47 = vld [vmem:[#allocation5 + $0x2e0] sm:$0xff]  ;;  %v137_v48 = vld [vmem:[#allocation2 + $0x2e8] sm:$0xff]  ;;  %772 = vst [vmem:[#allocation7 + $0x2c0] sm:$0xff] %v644_v41  ;;  %v646_v49 = vsel %vm390_vm10, %v518_v43, 0.0  ;;  %v520_v50 = vmul.f32 2.0, %v136_v46  ;;  %v138_v54 = vld [vmem:[#allocation2 + $0x2f0] sm:$0xff] }
  0x69   :  { %vm392_vm12 = vcmp.ge.f32.partialorder %v264_v47, 0.5  ;;  %v265_v51 = vld [vmem:[#allocation5 + $0x2e8] sm:$0xff]  ;;  %v521_v52 = vmul.f32 2.0, %v137_v48  ;;  %773 = vst [vmem:[#allocation7 + $0x2c8] sm:$0xff] %v645_v42  ;;  %v647_v53 = vsel %vm391_vm11, %v519_v45, 0.0  ;;  %v266_v55 = vld [vmem:[#allocation5 + $0x2f0] sm:$0xff] }
  0x6a   :  { %vm393_vm13 = vcmp.ge.f32.partialorder %v265_v51, 0.5  ;;  %v139_v56 = vld [vmem:[#allocation2 + $0x2f8] sm:$0xff]  ;;  %774 = vst [vmem:[#allocation7 + $0x2d0] sm:$0xff] %v646_v49  ;;  %v648_v57 = vsel %vm392_vm12, %v520_v50, 0.0  ;;  %vm394_vm14 = vcmp.ge.f32.partialorder %v266_v55, 0.5  ;;  %v522_v59 = vmul.f32 2.0, %v138_v54 }
  0x6b   :  { %v649_v58 = vsel %vm393_vm13, %v521_v52, 0.0  ;;  %v267_v60 = vld [vmem:[#allocation5 + $0x2f8] sm:$0xff]  ;;  %775 = vst [vmem:[#allocation7 + $0x2d8] sm:$0xff] %v647_v53  ;;  %v523_v61 = vmul.f32 2.0, %v139_v56  ;;  %v140_v62 = vld [vmem:[#allocation2 + $0x300] sm:$0xff]  ;;  %v141_v0 = vld [vmem:[#allocation2 + $0x308] sm:$0xff] }
  0x6c   :  { %vm395_vm15 = vcmp.ge.f32.partialorder %v267_v60, 0.5  ;;  %v268_v63 = vld [vmem:[#allocation5 + $0x300] sm:$0xff]  ;;  %776 = vst [vmem:[#allocation7 + $0x2e0] sm:$0xff] %v648_v57  ;;  %v650_v1 = vsel %vm394_vm14, %v522_v59, 0.0  ;;  %v524_v2 = vmul.f32 2.0, %v140_v62  ;;  %v269_v3 = vld [vmem:[#allocation5 + $0x308] sm:$0xff] }
  0x6d   :  { %vm396_vm0 = vcmp.ge.f32.partialorder %v268_v63, 0.5  ;;  %v525_v4 = vmul.f32 2.0, %v141_v0  ;;  %777 = vst [vmem:[#allocation7 + $0x2e8] sm:$0xff] %v649_v58  ;;  %v651_v5 = vsel %vm395_vm15, %v523_v61, 0.0  ;;  %vm397_vm1 = vcmp.ge.f32.partialorder %v269_v3, 0.5  ;;  %v142_v6 = vld [vmem:[#allocation2 + $0x310] sm:$0xff] }
  0x6e   :  { %v270_v7 = vld [vmem:[#allocation5 + $0x310] sm:$0xff]  ;;  %v143_v8 = vld [vmem:[#allocation2 + $0x318] sm:$0xff]  ;;  %778 = vst [vmem:[#allocation7 + $0x2f0] sm:$0xff] %v650_v1  ;;  %v652_v9 = vsel %vm396_vm0, %v524_v2, 0.0  ;;  %v526_v11 = vmul.f32 2.0, %v142_v6  ;;  %v144_v14 = vld [vmem:[#allocation2 + $0x320] sm:$0xff] }
  0x6f   :  { %v653_v10 = vsel %vm397_vm1, %v525_v4, 0.0  ;;  %vm398_vm2 = vcmp.ge.f32.partialorder %v270_v7, 0.5  ;;  %v271_v12 = vld [vmem:[#allocation5 + $0x318] sm:$0xff]  ;;  %779 = vst [vmem:[#allocation7 + $0x2f8] sm:$0xff] %v651_v5  ;;  %v527_v13 = vmul.f32 2.0, %v143_v8  ;;  %v272_v15 = vld [vmem:[#allocation5 + $0x320] sm:$0xff] }
  0x70   :  { %vm399_vm3 = vcmp.ge.f32.partialorder %v271_v12, 0.5  ;;  %v145_v16 = vld [vmem:[#allocation2 + $0x328] sm:$0xff]  ;;  %780 = vst [vmem:[#allocation7 + $0x300] sm:$0xff] %v652_v9  ;;  %v654_v17 = vsel %vm398_vm2, %v526_v11, 0.0  ;;  %vm400_vm4 = vcmp.ge.f32.partialorder %v272_v15, 0.5  ;;  %v528_v18 = vmul.f32 2.0, %v144_v14 }
  0x71   :  { %v273_v19 = vld [vmem:[#allocation5 + $0x328] sm:$0xff]  ;;  %v529_v20 = vmul.f32 2.0, %v145_v16  ;;  %781 = vst [vmem:[#allocation7 + $0x308] sm:$0xff] %v653_v10  ;;  %v655_v21 = vsel %vm399_vm3, %v527_v13, 0.0  ;;  %v146_v22 = vld [vmem:[#allocation2 + $0x330] sm:$0xff]  ;;  %v147_v24 = vld [vmem:[#allocation2 + $0x338] sm:$0xff] }
  0x72   :  { %vm401_vm5 = vcmp.ge.f32.partialorder %v273_v19, 0.5  ;;  %v274_v23 = vld [vmem:[#allocation5 + $0x330] sm:$0xff]  ;;  %782 = vst [vmem:[#allocation7 + $0x310] sm:$0xff] %v654_v17  ;;  %v656_v25 = vsel %vm400_vm4, %v528_v18, 0.0  ;;  %v530_v27 = vmul.f32 2.0, %v146_v22  ;;  %v275_v28 = vld [vmem:[#allocation5 + $0x338] sm:$0xff] }
  0x73   :  { %v657_v26 = vsel %vm401_vm5, %v529_v20, 0.0  ;;  %vm402_vm6 = vcmp.ge.f32.partialorder %v274_v23, 0.5  ;;  %783 = vst [vmem:[#allocation7 + $0x318] sm:$0xff] %v655_v21  ;;  %vm403_vm7 = vcmp.ge.f32.partialorder %v275_v28, 0.5  ;;  %v531_v29 = vmul.f32 2.0, %v147_v24  ;;  %v148_v30 = vld [vmem:[#allocation2 + $0x340] sm:$0xff] }
  0x74   :  { %v276_v31 = vld [vmem:[#allocation5 + $0x340] sm:$0xff]  ;;  %v149_v32 = vld [vmem:[#allocation2 + $0x348] sm:$0xff]  ;;  %784 = vst [vmem:[#allocation7 + $0x320] sm:$0xff] %v656_v25  ;;  %v658_v33 = vsel %vm402_vm6, %v530_v27, 0.0  ;;  %v532_v34 = vmul.f32 2.0, %v148_v30  ;;  %v150_v38 = vld [vmem:[#allocation2 + $0x350] sm:$0xff] }
  0x75   :  { %vm404_vm8 = vcmp.ge.f32.partialorder %v276_v31, 0.5  ;;  %v277_v35 = vld [vmem:[#allocation5 + $0x348] sm:$0xff]  ;;  %v533_v36 = vmul.f32 2.0, %v149_v32  ;;  %785 = vst [vmem:[#allocation7 + $0x328] sm:$0xff] %v657_v26  ;;  %v659_v37 = vsel %vm403_vm7, %v531_v29, 0.0  ;;  %v278_v39 = vld [vmem:[#allocation5 + $0x350] sm:$0xff] }
  0x76   :  { %vm405_vm9 = vcmp.ge.f32.partialorder %v277_v35, 0.5  ;;  %v151_v40 = vld [vmem:[#allocation2 + $0x358] sm:$0xff]  ;;  %786 = vst [vmem:[#allocation7 + $0x330] sm:$0xff] %v658_v33  ;;  %v660_v41 = vsel %vm404_vm8, %v532_v34, 0.0  ;;  %vm406_vm10 = vcmp.ge.f32.partialorder %v278_v39, 0.5  ;;  %v534_v43 = vmul.f32 2.0, %v150_v38 }
  0x77   :  { %v661_v42 = vsel %vm405_vm9, %v533_v36, 0.0  ;;  %v279_v44 = vld [vmem:[#allocation5 + $0x358] sm:$0xff]  ;;  %787 = vst [vmem:[#allocation7 + $0x338] sm:$0xff] %v659_v37  ;;  %v535_v45 = vmul.f32 2.0, %v151_v40  ;;  %v152_v46 = vld [vmem:[#allocation2 + $0x360] sm:$0xff]  ;;  %v153_v48 = vld [vmem:[#allocation2 + $0x368] sm:$0xff] }
  0x78   :  { %vm407_vm11 = vcmp.ge.f32.partialorder %v279_v44, 0.5  ;;  %v280_v47 = vld [vmem:[#allocation5 + $0x360] sm:$0xff]  ;;  %788 = vst [vmem:[#allocation7 + $0x340] sm:$0xff] %v660_v41  ;;  %v662_v49 = vsel %vm406_vm10, %v534_v43, 0.0  ;;  %v536_v50 = vmul.f32 2.0, %v152_v46  ;;  %v281_v51 = vld [vmem:[#allocation5 + $0x368] sm:$0xff] }
  0x79   :  { %vm408_vm12 = vcmp.ge.f32.partialorder %v280_v47, 0.5  ;;  %v537_v52 = vmul.f32 2.0, %v153_v48  ;;  %789 = vst [vmem:[#allocation7 + $0x348] sm:$0xff] %v661_v42  ;;  %v663_v53 = vsel %vm407_vm11, %v535_v45, 0.0  ;;  %vm409_vm13 = vcmp.ge.f32.partialorder %v281_v51, 0.5  ;;  %v154_v54 = vld [vmem:[#allocation2 + $0x370] sm:$0xff] }
  0x7a   :  { %v282_v55 = vld [vmem:[#allocation5 + $0x370] sm:$0xff]  ;;  %v155_v56 = vld [vmem:[#allocation2 + $0x378] sm:$0xff]  ;;  %790 = vst [vmem:[#allocation7 + $0x350] sm:$0xff] %v662_v49  ;;  %v664_v57 = vsel %vm408_vm12, %v536_v50, 0.0  ;;  %v538_v59 = vmul.f32 2.0, %v154_v54  ;;  %v156_v62 = vld [vmem:[#allocation2 + $0x380] sm:$0xff] }
  0x7b   :  { %v665_v58 = vsel %vm409_vm13, %v537_v52, 0.0  ;;  %vm410_vm14 = vcmp.ge.f32.partialorder %v282_v55, 0.5  ;;  %v283_v60 = vld [vmem:[#allocation5 + $0x378] sm:$0xff]  ;;  %791 = vst [vmem:[#allocation7 + $0x358] sm:$0xff] %v663_v53  ;;  %v539_v61 = vmul.f32 2.0, %v155_v56  ;;  %v284_v63 = vld [vmem:[#allocation5 + $0x380] sm:$0xff] }
  0x7c   :  { %vm411_vm15 = vcmp.ge.f32.partialorder %v283_v60, 0.5  ;;  %v157_v0 = vld [vmem:[#allocation2 + $0x388] sm:$0xff]  ;;  %792 = vst [vmem:[#allocation7 + $0x360] sm:$0xff] %v664_v57  ;;  %v666_v1 = vsel %vm410_vm14, %v538_v59, 0.0  ;;  %vm412_vm0 = vcmp.ge.f32.partialorder %v284_v63, 0.5  ;;  %v540_v2 = vmul.f32 2.0, %v156_v62 }
  0x7d   :  { %v285_v3 = vld [vmem:[#allocation5 + $0x388] sm:$0xff]  ;;  %v541_v4 = vmul.f32 2.0, %v157_v0  ;;  %793 = vst [vmem:[#allocation7 + $0x368] sm:$0xff] %v665_v58  ;;  %v667_v5 = vsel %vm411_vm15, %v539_v61, 0.0  ;;  %v158_v6 = vld [vmem:[#allocation2 + $0x390] sm:$0xff]  ;;  %v159_v8 = vld [vmem:[#allocation2 + $0x398] sm:$0xff] }
  0x7e   :  { %vm413_vm1 = vcmp.ge.f32.partialorder %v285_v3, 0.5  ;;  %v286_v7 = vld [vmem:[#allocation5 + $0x390] sm:$0xff]  ;;  %794 = vst [vmem:[#allocation7 + $0x370] sm:$0xff] %v666_v1  ;;  %v668_v9 = vsel %vm412_vm0, %v540_v2, 0.0  ;;  %v542_v11 = vmul.f32 2.0, %v158_v6  ;;  %v287_v12 = vld [vmem:[#allocation5 + $0x398] sm:$0xff] }
  0x7f   :  { %v669_v10 = vsel %vm413_vm1, %v541_v4, 0.0  ;;  %vm414_vm2 = vcmp.ge.f32.partialorder %v286_v7, 0.5  ;;  %795 = vst [vmem:[#allocation7 + $0x378] sm:$0xff] %v667_v5  ;;  %vm415_vm3 = vcmp.ge.f32.partialorder %v287_v12, 0.5  ;;  %v543_v13 = vmul.f32 2.0, %v159_v8  ;;  %v160_v14 = vld [vmem:[#allocation2 + $0x3a0] sm:$0xff] }
  0x80   :  { %v288_v15 = vld [vmem:[#allocation5 + $0x3a0] sm:$0xff]  ;;  %v161_v16 = vld [vmem:[#allocation2 + $0x3a8] sm:$0xff]  ;;  %796 = vst [vmem:[#allocation7 + $0x380] sm:$0xff] %v668_v9  ;;  %v670_v17 = vsel %vm414_vm2, %v542_v11, 0.0  ;;  %v544_v18 = vmul.f32 2.0, %v160_v14  ;;  %v162_v22 = vld [vmem:[#allocation2 + $0x3b0] sm:$0xff] }
  0x81   :  { %vm416_vm4 = vcmp.ge.f32.partialorder %v288_v15, 0.5  ;;  %v289_v19 = vld [vmem:[#allocation5 + $0x3a8] sm:$0xff]  ;;  %v545_v20 = vmul.f32 2.0, %v161_v16  ;;  %797 = vst [vmem:[#allocation7 + $0x388] sm:$0xff] %v669_v10  ;;  %v671_v21 = vsel %vm415_vm3, %v543_v13, 0.0  ;;  %v290_v23 = vld [vmem:[#allocation5 + $0x3b0] sm:$0xff] }
  0x82   :  { %vm417_vm5 = vcmp.ge.f32.partialorder %v289_v19, 0.5  ;;  %v163_v24 = vld [vmem:[#allocation2 + $0x3b8] sm:$0xff]  ;;  %798 = vst [vmem:[#allocation7 + $0x390] sm:$0xff] %v670_v17  ;;  %v672_v25 = vsel %vm416_vm4, %v544_v18, 0.0  ;;  %vm418_vm6 = vcmp.ge.f32.partialorder %v290_v23, 0.5  ;;  %v546_v27 = vmul.f32 2.0, %v162_v22 }
  0x83   :  { %v673_v26 = vsel %vm417_vm5, %v545_v20, 0.0  ;;  %v291_v28 = vld [vmem:[#allocation5 + $0x3b8] sm:$0xff]  ;;  %799 = vst [vmem:[#allocation7 + $0x398] sm:$0xff] %v671_v21  ;;  %v547_v29 = vmul.f32 2.0, %v163_v24  ;;  %v164_v30 = vld [vmem:[#allocation2 + $0x3c0] sm:$0xff]  ;;  %v165_v32 = vld [vmem:[#allocation2 + $0x3c8] sm:$0xff] }
  0x84   :  { %vm419_vm7 = vcmp.ge.f32.partialorder %v291_v28, 0.5  ;;  %v292_v31 = vld [vmem:[#allocation5 + $0x3c0] sm:$0xff]  ;;  %800 = vst [vmem:[#allocation7 + $0x3a0] sm:$0xff] %v672_v25  ;;  %v674_v33 = vsel %vm418_vm6, %v546_v27, 0.0  ;;  %v548_v34 = vmul.f32 2.0, %v164_v30  ;;  %v293_v35 = vld [vmem:[#allocation5 + $0x3c8] sm:$0xff] }
  0x85   :  { %vm420_vm8 = vcmp.ge.f32.partialorder %v292_v31, 0.5  ;;  %v549_v36 = vmul.f32 2.0, %v165_v32  ;;  %801 = vst [vmem:[#allocation7 + $0x3a8] sm:$0xff] %v673_v26  ;;  %v675_v37 = vsel %vm419_vm7, %v547_v29, 0.0  ;;  %vm421_vm9 = vcmp.ge.f32.partialorder %v293_v35, 0.5  ;;  %v166_v38 = vld [vmem:[#allocation2 + $0x3d0] sm:$0xff] }
  0x86   :  { %v294_v39 = vld [vmem:[#allocation5 + $0x3d0] sm:$0xff]  ;;  %v167_v40 = vld [vmem:[#allocation2 + $0x3d8] sm:$0xff]  ;;  %802 = vst [vmem:[#allocation7 + $0x3b0] sm:$0xff] %v674_v33  ;;  %v676_v41 = vsel %vm420_vm8, %v548_v34, 0.0  ;;  %v550_v43 = vmul.f32 2.0, %v166_v38  ;;  %v168_v46 = vld [vmem:[#allocation2 + $0x3e0] sm:$0xff] }
  0x87   :  { %v677_v42 = vsel %vm421_vm9, %v549_v36, 0.0  ;;  %vm422_vm10 = vcmp.ge.f32.partialorder %v294_v39, 0.5  ;;  %v295_v44 = vld [vmem:[#allocation5 + $0x3d8] sm:$0xff]  ;;  %803 = vst [vmem:[#allocation7 + $0x3b8] sm:$0xff] %v675_v37  ;;  %v551_v45 = vmul.f32 2.0, %v167_v40  ;;  %v296_v47 = vld [vmem:[#allocation5 + $0x3e0] sm:$0xff] }
  0x88   :  { %vm423_vm11 = vcmp.ge.f32.partialorder %v295_v44, 0.5  ;;  %v169_v48 = vld [vmem:[#allocation2 + $0x3e8] sm:$0xff]  ;;  %804 = vst [vmem:[#allocation7 + $0x3c0] sm:$0xff] %v676_v41  ;;  %v678_v49 = vsel %vm422_vm10, %v550_v43, 0.0  ;;  %vm424_vm12 = vcmp.ge.f32.partialorder %v296_v47, 0.5  ;;  %v552_v50 = vmul.f32 2.0, %v168_v46 }
  0x89   :  { %v297_v51 = vld [vmem:[#allocation5 + $0x3e8] sm:$0xff]  ;;  %v553_v52 = vmul.f32 2.0, %v169_v48  ;;  %805 = vst [vmem:[#allocation7 + $0x3c8] sm:$0xff] %v677_v42  ;;  %v679_v53 = vsel %vm423_vm11, %v551_v45, 0.0  ;;  %v170_v54 = vld [vmem:[#allocation2 + $0x3f0] sm:$0xff]  ;;  %v171_v56 = vld [vmem:[#allocation2 + $0x3f8] sm:$0xff] }
  0x8a   :  { %vm425_vm13 = vcmp.ge.f32.partialorder %v297_v51, 0.5  ;;  %v298_v55 = vld [vmem:[#allocation5 + $0x3f0] sm:$0xff]  ;;  %806 = vst [vmem:[#allocation7 + $0x3d0] sm:$0xff] %v678_v49  ;;  %v680_v57 = vsel %vm424_vm12, %v552_v50, 0.0  ;;  %v554_v59 = vmul.f32 2.0, %v170_v54  ;;  %v299_v60 = vld [vmem:[#allocation5 + $0x3f8] sm:$0xff] }
  0x8b   :  { %v681_v58 = vsel %vm425_vm13, %v553_v52, 0.0  ;;  %vm426_vm14 = vcmp.ge.f32.partialorder %v298_v55, 0.5  ;;  %807 = vst [vmem:[#allocation7 + $0x3d8] sm:$0xff] %v679_v53  ;;  %vm427_vm15 = vcmp.ge.f32.partialorder %v299_v60, 0.5  ;;  %v555_v61 = vmul.f32 2.0, %v171_v56 }
  0x8c   :  { %808 = vst [vmem:[#allocation7 + $0x3e0] sm:$0xff] %v680_v57  ;;  %v682_v62 = vsel %vm426_vm14, %v554_v59, 0.0 }
  0x8d   :  { %809 = vst [vmem:[#allocation7 + $0x3e8] sm:$0xff] %v681_v58  ;;  %v683_v63 = vsel %vm427_vm15, %v555_v61, 0.0 }
  0x8e   :  { %810 = vst [vmem:[#allocation7 + $0x3f0] sm:$0xff] %v682_v62 }
  0x8f   :  { %811 = vst [vmem:[#allocation7 + $0x3f8] sm:$0xff] %v683_v63 }
  0x90   :  { %824 = dma.vmem_to_hbm [thread:$0]  %s817_s23, 16384, %s819_s21, [#allocation4], %s916_s17, %s916_s17, %s917_s18  }
  0x91   :  { %913 = dma.done.wait [#allocation4], 16384  }
  0x92   :  { %914 = vsyncadd [#allocation4], 4294950912 }
  0x93   :  { %829 = vsyncpa [#allocation3], 1 }
  0x94   :  { %830 = vsyncpa [#allocation6], 1 }
  0x95   :  { %831 = vsyncpa [#allocation4], 1 }

</bundles_post_ra>
